<compile_context>
chip_gen: v7x
topology: tpu7x:2x2x1
jax: 0.10.0
libtpu: 0.0.40
codegen_flags: <defaults>
</compile_context>

<pallas_src>
import functools

import jax
import jax.numpy as jnp
from jax import lax
from jax.experimental import pallas as pl
from jax.experimental.pallas import tpu as pltpu

EPS = 1e-5


def residual_block_kernel(x_ref, w1_ref, g1_ref, b1_ref, w2_ref, g2_ref, b2_ref,
                          mask_ref, o_ref, *, width):
    # x_ref / o_ref : (nb, Cp, P)   P = H*W, lane-dense spatial axis
    # w*_ref        : (Cp, 9*Cp)    im2col-folded conv weights (zero-padded)
    # g*/b*_ref     : (Cp, 1)       InstanceNorm affine params (zero-padded)
    # mask_ref      : (9, P)        per-tap zero-padding validity masks
    nb, cp, p = x_ref.shape
    x = x_ref[...].astype(jnp.float32)                    # (nb, cp, p)

    # Hoist the 9 tap masks once per grid step; reused by both convs.
    tap_masks = [mask_ref[t:t + 1, :] for t in range(9)]  # list of (1, p)

    def conv3x3(a, w_ref):
        # a: (nb, cp, p) f32 -> (nb, cp, p) f32.
        # Taps are built with lane rolls on a 2-D (nb*cp, p) view (per-row roll,
        # so no cross-sample / cross-channel wrap), then concatenated into a
        # tile-aligned (nb, 9*cp, p) im2col block.
        a2 = a.reshape(nb * cp, p)
        cols = []
        for t in range(9):
            dy, dx = divmod(t, 3)
            if dy == 1 and dx == 1:
                cols.append(a)                             # center tap: no shift
            else:
                s = (dy - 1) * width + (dx - 1)
                rolled = pltpu.roll(a2, shift=(-s) % p, axis=1)
                cols.append((rolled * tap_masks[t]).reshape(nb, cp, p))
        m = jnp.concatenate(cols, axis=1)                  # (nb, 9*cp, p)
        # Batched MXU contraction: nb is a dot_general batch dim, so the result
        # lands directly in (nb, cp, p) with no transposes.
        w_b = jnp.broadcast_to(w_ref[...], (nb, cp, 9 * cp))
        return jnp.einsum('nok,nkp->nop', w_b, m,
                          preferred_element_type=jnp.float32)

    def instance_norm(y, g_ref, b_ref):
        # one-pass, per-(sample, channel) biased stats over the lane axis
        inv_p = 1.0 / p
        s1 = jnp.sum(y, axis=-1, keepdims=True)            # (nb, cp, 1)
        s2 = jnp.sum(y * y, axis=-1, keepdims=True)
        mean = s1 * inv_p
        var = s2 * inv_p - mean * mean
        scale = g_ref[...].reshape(1, cp, 1) * lax.rsqrt(var + EPS)
        shift = b_ref[...].reshape(1, cp, 1) - mean * scale
        return y * scale + shift

    h = conv3x3(x, w1_ref)
    h = instance_norm(h, g1_ref, b1_ref)
    h = jnp.maximum(h, 0.0)                                 # ReLU
    h = conv3x3(h, w2_ref)
    h = instance_norm(h, g2_ref, b2_ref)

    o_ref[...] = (x + h).astype(o_ref.dtype)                # residual, dense store


def _vmem_limit_bytes():
    """Scoped-VMEM limit: generous on v5e/v6e (128 MiB), capped on v7x (64 MiB)."""
    try:
        cap = int(pltpu.get_tpu_info().vmem_capacity_bytes)
    except Exception:
        cap = 64 * 1024 * 1024
    return max(32 * 1024 * 1024, min(cap - 8 * 1024 * 1024, 100 * 1024 * 1024))


def _pick_nb(N, Cp, P, vmem_limit):
    """Largest nb (divides N) whose working set fits the VMEM budget, keeping
    >= 2 grid steps (v7x has 2 TensorCores) and stopping once the per-step
    input block is comfortably past the ~1 MiB overhead-amortization point."""
    per_sample_ws = 26 * Cp * P * 4        # rough in-flight f32 bytes / sample
    budget = int(0.75 * vmem_limit)
    target_block = 1 << 20
    nb = 1
    for cand in range(1, N + 1):
        if N % cand != 0:
            continue
        if N >= 2 and N // cand < 2:
            continue
        if cand * per_sample_ws > budget:
            continue
        nb = cand
        if cand * Cp * P * 4 >= target_block:
            break
    return nb


def residual_block(x_nchw, w1_oihw, gamma1, beta1, w2_oihw, gamma2, beta2, *, nb=None):
    """NCHW in / NCHW out.  Conv weights in PyTorch OIHW layout."""
    N, C, H, W = x_nchw.shape
    assert w1_oihw.shape == (C, C, 3, 3) and w2_oihw.shape == (C, C, 3, 3), (
        "ResidualBlock requires dim_in == dim_out for the residual add")
    P = H * W
    Cp = ((C + 7) // 8) * 8                 # fill the 8-sublane vregs

    # lane-dense flattening + zero channel padding (no HBM layout transpose)
    x = x_nchw.reshape(N, C, P)
    if Cp != C:
        x = jnp.pad(x, ((0, 0), (0, Cp - C), (0, 0)))

    def fold_w(w):
        # w2d[o, (dy*3+dx)*Cp + ci] = w[o, ci, dy, dx], zero-padded channels
        w = jnp.transpose(w, (0, 2, 3, 1))                     # (O, 3, 3, I)
        w = jnp.pad(w, ((0, Cp - C), (0, 0), (0, 0), (0, Cp - C)))
        return w.reshape(Cp, 9 * Cp).astype(jnp.float32)

    def pad_param(v):
        return jnp.pad(v.astype(jnp.float32), (0, Cp - C)).reshape(Cp, 1)

    w1 = fold_w(w1_oihw)
    w2 = fold_w(w2_oihw)
    g1, b1 = pad_param(gamma1), pad_param(beta1)
    g2, b2 = pad_param(gamma2), pad_param(beta2)

    # per-tap validity masks over the flattened spatial axis (zero padding)
    hh = jnp.arange(H)
    ww = jnp.arange(W)
    masks = []
    for dy in range(3):
        mh = (hh + dy - 1 >= 0) & (hh + dy - 1 < H)
        for dx in range(3):
            mw = (ww + dx - 1 >= 0) & (ww + dx - 1 < W)
            masks.append((mh[:, None] & mw[None, :]).reshape(P))
    mask = jnp.stack(masks).astype(jnp.float32)                # (9, P)

    vmem_limit = _vmem_limit_bytes()
    if nb is None:
        nb = _pick_nb(N, Cp, P, vmem_limit)
    assert N % nb == 0, "batch must be divisible by nb"

    kernel = functools.partial(residual_block_kernel, width=W)
    out = pl.pallas_call(
        kernel,
        out_shape=jax.ShapeDtypeStruct((N, Cp, P), x_nchw.dtype),
        grid=(N // nb,),
        in_specs=[
            pl.BlockSpec((nb, Cp, P), lambda i: (i, 0, 0)),
            pl.BlockSpec((Cp, 9 * Cp), lambda i: (0, 0)),
            pl.BlockSpec((Cp, 1), lambda i: (0, 0)),
            pl.BlockSpec((Cp, 1), lambda i: (0, 0)),
            pl.BlockSpec((Cp, 9 * Cp), lambda i: (0, 0)),
            pl.BlockSpec((Cp, 1), lambda i: (0, 0)),
            pl.BlockSpec((Cp, 1), lambda i: (0, 0)),
            pl.BlockSpec((9, P), lambda i: (0, 0)),
        ],
        out_specs=pl.BlockSpec((nb, Cp, P), lambda i: (i, 0, 0)),
        compiler_params=pltpu.CompilerParams(
            dimension_semantics=("parallel",),
            vmem_limit_bytes=vmem_limit,
        ),
    )(x, w1, g1, b1, w2, g2, b2, mask)
    return out[:, :C, :].reshape(N, C, H, W)


def residual_block_ref(x, w1, g1, b1, w2, g2, b2):
    """Pure-JAX reference (NCHW) mirroring the PyTorch forward."""
    def conv(inp, w):
        return lax.conv_general_dilated(
            inp, w, window_strides=(1, 1), padding=((1, 1), (1, 1)),
            dimension_numbers=('NCHW', 'OIHW', 'NCHW'))

    def inorm(y, g, b):
        mean = jnp.mean(y, axis=(2, 3), keepdims=True)
        var = jnp.mean((y - mean) ** 2, axis=(2, 3), keepdims=True)
        yn = (y - mean) * lax.rsqrt(var + EPS)
        return yn * g.reshape(1, -1, 1, 1) + b.reshape(1, -1, 1, 1)

    h = conv(x, w1)
    h = inorm(h, g1, b1)
    h = jnp.maximum(h, 0.0)
    h = conv(h, w2)
    h = inorm(h, g2, b2)
    return x + h


if __name__ == "__main__":
    N, C, H, W = 2, 4, 16, 16                 # dim_in == dim_out == 4
    key = jax.random.PRNGKey(0)
    kx, kw1, kw2, kg1, kb1, kg2, kb2 = jax.random.split(key, 7)

    x = jax.random.normal(kx, (N, C, H, W), dtype=jnp.float32)
    # Conv2d(dim_in, dim_out, 3, 1, 1, bias=False) weights: (Cout, Cin, 3, 3)
    w1 = jax.random.normal(kw1, (C, C, 3, 3), dtype=jnp.float32) * 0.1
    w2 = jax.random.normal(kw2, (C, C, 3, 3), dtype=jnp.float32) * 0.1
    # InstanceNorm2d(affine=True) params: (Cout,)
    gamma1 = 1.0 + 0.1 * jax.random.normal(kg1, (C,), dtype=jnp.float32)
    beta1 = 0.1 * jax.random.normal(kb1, (C,), dtype=jnp.float32)
    gamma2 = 1.0 + 0.1 * jax.random.normal(kg2, (C,), dtype=jnp.float32)
    beta2 = 0.1 * jax.random.normal(kb2, (C,), dtype=jnp.float32)

    out = residual_block(x, w1, gamma1, beta1, w2, gamma2, beta2)
    out = jax.block_until_ready(out)

    ref = residual_block_ref(x, w1, gamma1, beta1, w2, gamma2, beta2)
    assert out.shape == (N, C, H, W)
    assert jnp.allclose(out, ref, rtol=1e-4, atol=1e-4), (
        f"max abs err {jnp.max(jnp.abs(out - ref))}")

    print("KERNEL_OK")
</pallas_src>

<mosaic_0001>
module attributes {stable_mosaic.version = 11 : i64} {
  func.func @residual_block_kernel(%arg0: i32, %arg1: memref<1x8x256xf32, #tpu.memory_space<vmem>>, %arg2: memref<8x72xf32, #tpu.memory_space<vmem>>, %arg3: memref<8x1xf32, #tpu.memory_space<vmem>>, %arg4: memref<8x1xf32, #tpu.memory_space<vmem>>, %arg5: memref<8x72xf32, #tpu.memory_space<vmem>>, %arg6: memref<8x1xf32, #tpu.memory_space<vmem>>, %arg7: memref<8x1xf32, #tpu.memory_space<vmem>>, %arg8: memref<9x256xf32, #tpu.memory_space<vmem>>, %arg9: memref<1x8x256xf32, #tpu.memory_space<vmem>>) attributes {dimension_semantics = [#tpu.dimension_semantics<parallel>], iteration_bounds = array<i64: 2>, scalar_prefetch = 0 : i64, scratch_operands = 0 : i64, tpu.core_type = #tpu.core_type<tc>, window_params = [{transform_indices = @transform_0, window_bounds = array<i64: 1, 8, 256>}, {pipeline_mode = #tpu.pipeline_mode<synchronous>, transform_indices = @transform_1, window_bounds = array<i64: 8, 72>}, {pipeline_mode = #tpu.pipeline_mode<synchronous>, transform_indices = @transform_2, window_bounds = array<i64: 8, 1>}, {pipeline_mode = #tpu.pipeline_mode<synchronous>, transform_indices = @transform_3, window_bounds = array<i64: 8, 1>}, {pipeline_mode = #tpu.pipeline_mode<synchronous>, transform_indices = @transform_4, window_bounds = array<i64: 8, 72>}, {pipeline_mode = #tpu.pipeline_mode<synchronous>, transform_indices = @transform_5, window_bounds = array<i64: 8, 1>}, {pipeline_mode = #tpu.pipeline_mode<synchronous>, transform_indices = @transform_6, window_bounds = array<i64: 8, 1>}, {pipeline_mode = #tpu.pipeline_mode<synchronous>, transform_indices = @transform_7, window_bounds = array<i64: 9, 256>}, {transform_indices = @transform_8, window_bounds = array<i64: 1, 8, 256>}]} {
    %c0 = arith.constant 0 : index
    %c0_0 = arith.constant 0 : index
    %c0_1 = arith.constant 0 : index
    %0 = vector.load %arg1[%c0, %c0_0, %c0_1] : memref<1x8x256xf32, #tpu.memory_space<vmem>>, vector<1x8x256xf32>
    %c0_2 = arith.constant 0 : index
    %c0_3 = arith.constant 0 : index
    %1 = vector.load %arg8[%c0_2, %c0_3] : memref<9x256xf32, #tpu.memory_space<vmem>>, vector<1x256xf32>
    %c1 = arith.constant 1 : index
    %c0_4 = arith.constant 0 : index
    %2 = vector.load %arg8[%c1, %c0_4] : memref<9x256xf32, #tpu.memory_space<vmem>>, vector<1x256xf32>
    %c2 = arith.constant 2 : index
    %c0_5 = arith.constant 0 : index
    %3 = vector.load %arg8[%c2, %c0_5] : memref<9x256xf32, #tpu.memory_space<vmem>>, vector<1x256xf32>
    %c3 = arith.constant 3 : index
    %c0_6 = arith.constant 0 : index
    %4 = vector.load %arg8[%c3, %c0_6] : memref<9x256xf32, #tpu.memory_space<vmem>>, vector<1x256xf32>
    %c5 = arith.constant 5 : index
    %c0_7 = arith.constant 0 : index
    %5 = vector.load %arg8[%c5, %c0_7] : memref<9x256xf32, #tpu.memory_space<vmem>>, vector<1x256xf32>
    %c6 = arith.constant 6 : index
    %c0_8 = arith.constant 0 : index
    %6 = vector.load %arg8[%c6, %c0_8] : memref<9x256xf32, #tpu.memory_space<vmem>>, vector<1x256xf32>
    %c7 = arith.constant 7 : index
    %c0_9 = arith.constant 0 : index
    %7 = vector.load %arg8[%c7, %c0_9] : memref<9x256xf32, #tpu.memory_space<vmem>>, vector<1x256xf32>
    %c8 = arith.constant 8 : index
    %c0_10 = arith.constant 0 : index
    %8 = vector.load %arg8[%c8, %c0_10] : memref<9x256xf32, #tpu.memory_space<vmem>>, vector<1x256xf32>
    %9 = vector.shape_cast %0 : vector<1x8x256xf32> to vector<8x256xf32>
    %c17_i32 = arith.constant 17 : i32
    %10 = tpu.dynamic_rotate %9 by %c17_i32 dim 1 : vector<8x256xf32>, i32 -> vector<8x256xf32>
    %11 = vector.broadcast %1 : vector<1x256xf32> to vector<8x256xf32>
    %12 = arith.mulf %10, %11 : vector<8x256xf32>
    %13 = vector.shape_cast %12 : vector<8x256xf32> to vector<1x8x256xf32>
    %c16_i32 = arith.constant 16 : i32
    %14 = tpu.dynamic_rotate %9 by %c16_i32 dim 1 : vector<8x256xf32>, i32 -> vector<8x256xf32>
    %15 = vector.broadcast %2 : vector<1x256xf32> to vector<8x256xf32>
    %16 = arith.mulf %14, %15 : vector<8x256xf32>
    %17 = vector.shape_cast %16 : vector<8x256xf32> to vector<1x8x256xf32>
    %c15_i32 = arith.constant 15 : i32
    %18 = tpu.dynamic_rotate %9 by %c15_i32 dim 1 : vector<8x256xf32>, i32 -> vector<8x256xf32>
    %19 = vector.broadcast %3 : vector<1x256xf32> to vector<8x256xf32>
    %20 = arith.mulf %18, %19 : vector<8x256xf32>
    %21 = vector.shape_cast %20 : vector<8x256xf32> to vector<1x8x256xf32>
    %c1_i32 = arith.constant 1 : i32
    %22 = tpu.dynamic_rotate %9 by %c1_i32 dim 1 : vector<8x256xf32>, i32 -> vector<8x256xf32>
    %23 = vector.broadcast %4 : vector<1x256xf32> to vector<8x256xf32>
    %24 = arith.mulf %22, %23 : vector<8x256xf32>
    %25 = vector.shape_cast %24 : vector<8x256xf32> to vector<1x8x256xf32>
    %c255_i32 = arith.constant 255 : i32
    %26 = tpu.dynamic_rotate %9 by %c255_i32 dim 1 : vector<8x256xf32>, i32 -> vector<8x256xf32>
    %27 = vector.broadcast %5 : vector<1x256xf32> to vector<8x256xf32>
    %28 = arith.mulf %26, %27 : vector<8x256xf32>
    %29 = vector.shape_cast %28 : vector<8x256xf32> to vector<1x8x256xf32>
    %c241_i32 = arith.constant 241 : i32
    %30 = tpu.dynamic_rotate %9 by %c241_i32 dim 1 : vector<8x256xf32>, i32 -> vector<8x256xf32>
    %31 = vector.broadcast %6 : vector<1x256xf32> to vector<8x256xf32>
    %32 = arith.mulf %30, %31 : vector<8x256xf32>
    %33 = vector.shape_cast %32 : vector<8x256xf32> to vector<1x8x256xf32>
    %c240_i32 = arith.constant 240 : i32
    %34 = tpu.dynamic_rotate %9 by %c240_i32 dim 1 : vector<8x256xf32>, i32 -> vector<8x256xf32>
    %35 = vector.broadcast %7 : vector<1x256xf32> to vector<8x256xf32>
    %36 = arith.mulf %34, %35 : vector<8x256xf32>
    %37 = vector.shape_cast %36 : vector<8x256xf32> to vector<1x8x256xf32>
    %c239_i32 = arith.constant 239 : i32
    %38 = tpu.dynamic_rotate %9 by %c239_i32 dim 1 : vector<8x256xf32>, i32 -> vector<8x256xf32>
    %39 = vector.broadcast %8 : vector<1x256xf32> to vector<8x256xf32>
    %40 = arith.mulf %38, %39 : vector<8x256xf32>
    %41 = vector.shape_cast %40 : vector<8x256xf32> to vector<1x8x256xf32>
    %42 = tpu.concatenate %13, %17, %21, %25, %0, %29, %33, %37, %41 in 1 : vector<1x8x256xf32>, vector<1x8x256xf32>, vector<1x8x256xf32>, vector<1x8x256xf32>, vector<1x8x256xf32>, vector<1x8x256xf32>, vector<1x8x256xf32>, vector<1x8x256xf32>, vector<1x8x256xf32> -> vector<1x72x256xf32>
    %c0_11 = arith.constant 0 : index
    %c0_12 = arith.constant 0 : index
    %43 = vector.load %arg2[%c0_11, %c0_12] : memref<8x72xf32, #tpu.memory_space<vmem>>, vector<8x72xf32>
    %44 = vector.shape_cast %43 : vector<8x72xf32> to vector<1x8x72xf32>
    "tpu.trace_start"() <{level = 10 : i32, message = "nok,nkp->nop"}> : () -> ()
    %cst = arith.constant dense<0.000000e+00> : vector<1x8x256xf32>
    %45 = tpu.matmul %44, %42, %cst {dimension_numbers = #tpu.dot_dimension_numbers<[2], [1], [1], [2], [0, 0, 0, 1, 1, 2], [0], [0]>} : vector<1x8x72xf32>, vector<1x72x256xf32>, vector<1x8x256xf32> -> vector<1x8x256xf32>
    "tpu.trace_stop"() : () -> ()
    %cst_13 = arith.constant dense<0.000000e+00> : vector<1x8xf32>
    %46 = vector.multi_reduction <add>, %45, %cst_13 [2] : vector<1x8x256xf32> to vector<1x8xf32>
    %47 = vector.shape_cast %46 : vector<1x8xf32> to vector<1x8x1xf32>
    %48 = arith.mulf %45, %45 : vector<1x8x256xf32>
    %cst_14 = arith.constant dense<0.000000e+00> : vector<1x8xf32>
    %49 = vector.multi_reduction <add>, %48, %cst_14 [2] : vector<1x8x256xf32> to vector<1x8xf32>
    %50 = vector.shape_cast %49 : vector<1x8xf32> to vector<1x8x1xf32>
    %cst_15 = arith.constant 3.906250e-03 : f32
    %51 = vector.broadcast %cst_15 : f32 to vector<1x8x1xf32>
    %52 = arith.mulf %47, %51 : vector<1x8x1xf32>
    %cst_16 = arith.constant 3.906250e-03 : f32
    %53 = vector.broadcast %cst_16 : f32 to vector<1x8x1xf32>
    %54 = arith.mulf %50, %53 : vector<1x8x1xf32>
    %55 = arith.mulf %52, %52 : vector<1x8x1xf32>
    %56 = arith.subf %54, %55 : vector<1x8x1xf32>
    %c0_17 = arith.constant 0 : index
    %c0_18 = arith.constant 0 : index
    %57 = vector.load %arg3[%c0_17, %c0_18] : memref<8x1xf32, #tpu.memory_space<vmem>>, vector<8x1xf32>
    %58 = vector.shape_cast %57 : vector<8x1xf32> to vector<1x8x1xf32>
    %cst_19 = arith.constant 9.99999974E-6 : f32
    %59 = vector.broadcast %cst_19 : f32 to vector<1x8x1xf32>
    %60 = arith.addf %56, %59 : vector<1x8x1xf32>
    %61 = math.rsqrt %60 : vector<1x8x1xf32>
    %62 = arith.mulf %58, %61 : vector<1x8x1xf32>
    %c0_20 = arith.constant 0 : index
    %c0_21 = arith.constant 0 : index
    %63 = vector.load %arg4[%c0_20, %c0_21] : memref<8x1xf32, #tpu.memory_space<vmem>>, vector<8x1xf32>
    %64 = vector.shape_cast %63 : vector<8x1xf32> to vector<1x8x1xf32>
    %65 = arith.mulf %52, %62 : vector<1x8x1xf32>
    %66 = arith.subf %64, %65 : vector<1x8x1xf32>
    %67 = vector.broadcast %62 : vector<1x8x1xf32> to vector<1x8x256xf32>
    %68 = arith.mulf %45, %67 : vector<1x8x256xf32>
    %69 = vector.broadcast %66 : vector<1x8x1xf32> to vector<1x8x256xf32>
    %70 = arith.addf %68, %69 : vector<1x8x256xf32>
    %cst_22 = arith.constant 0.000000e+00 : f32
    %71 = vector.broadcast %cst_22 : f32 to vector<1x8x256xf32>
    %72 = arith.maximumf %70, %71 : vector<1x8x256xf32>
    %73 = vector.shape_cast %72 : vector<1x8x256xf32> to vector<8x256xf32>
    %c17_i32_23 = arith.constant 17 : i32
    %74 = tpu.dynamic_rotate %73 by %c17_i32_23 dim 1 : vector<8x256xf32>, i32 -> vector<8x256xf32>
    %75 = vector.broadcast %1 : vector<1x256xf32> to vector<8x256xf32>
    %76 = arith.mulf %74, %75 : vector<8x256xf32>
    %77 = vector.shape_cast %76 : vector<8x256xf32> to vector<1x8x256xf32>
    %c16_i32_24 = arith.constant 16 : i32
    %78 = tpu.dynamic_rotate %73 by %c16_i32_24 dim 1 : vector<8x256xf32>, i32 -> vector<8x256xf32>
    %79 = vector.broadcast %2 : vector<1x256xf32> to vector<8x256xf32>
    %80 = arith.mulf %78, %79 : vector<8x256xf32>
    %81 = vector.shape_cast %80 : vector<8x256xf32> to vector<1x8x256xf32>
    %c15_i32_25 = arith.constant 15 : i32
    %82 = tpu.dynamic_rotate %73 by %c15_i32_25 dim 1 : vector<8x256xf32>, i32 -> vector<8x256xf32>
    %83 = vector.broadcast %3 : vector<1x256xf32> to vector<8x256xf32>
    %84 = arith.mulf %82, %83 : vector<8x256xf32>
    %85 = vector.shape_cast %84 : vector<8x256xf32> to vector<1x8x256xf32>
    %c1_i32_26 = arith.constant 1 : i32
    %86 = tpu.dynamic_rotate %73 by %c1_i32_26 dim 1 : vector<8x256xf32>, i32 -> vector<8x256xf32>
    %87 = vector.broadcast %4 : vector<1x256xf32> to vector<8x256xf32>
    %88 = arith.mulf %86, %87 : vector<8x256xf32>
    %89 = vector.shape_cast %88 : vector<8x256xf32> to vector<1x8x256xf32>
    %c255_i32_27 = arith.constant 255 : i32
    %90 = tpu.dynamic_rotate %73 by %c255_i32_27 dim 1 : vector<8x256xf32>, i32 -> vector<8x256xf32>
    %91 = vector.broadcast %5 : vector<1x256xf32> to vector<8x256xf32>
    %92 = arith.mulf %90, %91 : vector<8x256xf32>
    %93 = vector.shape_cast %92 : vector<8x256xf32> to vector<1x8x256xf32>
    %c241_i32_28 = arith.constant 241 : i32
    %94 = tpu.dynamic_rotate %73 by %c241_i32_28 dim 1 : vector<8x256xf32>, i32 -> vector<8x256xf32>
    %95 = vector.broadcast %6 : vector<1x256xf32> to vector<8x256xf32>
    %96 = arith.mulf %94, %95 : vector<8x256xf32>
    %97 = vector.shape_cast %96 : vector<8x256xf32> to vector<1x8x256xf32>
    %c240_i32_29 = arith.constant 240 : i32
    %98 = tpu.dynamic_rotate %73 by %c240_i32_29 dim 1 : vector<8x256xf32>, i32 -> vector<8x256xf32>
    %99 = vector.broadcast %7 : vector<1x256xf32> to vector<8x256xf32>
    %100 = arith.mulf %98, %99 : vector<8x256xf32>
    %101 = vector.shape_cast %100 : vector<8x256xf32> to vector<1x8x256xf32>
    %c239_i32_30 = arith.constant 239 : i32
    %102 = tpu.dynamic_rotate %73 by %c239_i32_30 dim 1 : vector<8x256xf32>, i32 -> vector<8x256xf32>
    %103 = vector.broadcast %8 : vector<1x256xf32> to vector<8x256xf32>
    %104 = arith.mulf %102, %103 : vector<8x256xf32>
    %105 = vector.shape_cast %104 : vector<8x256xf32> to vector<1x8x256xf32>
    %106 = tpu.concatenate %77, %81, %85, %89, %72, %93, %97, %101, %105 in 1 : vector<1x8x256xf32>, vector<1x8x256xf32>, vector<1x8x256xf32>, vector<1x8x256xf32>, vector<1x8x256xf32>, vector<1x8x256xf32>, vector<1x8x256xf32>, vector<1x8x256xf32>, vector<1x8x256xf32> -> vector<1x72x256xf32>
    %c0_31 = arith.constant 0 : index
    %c0_32 = arith.constant 0 : index
    %107 = vector.load %arg5[%c0_31, %c0_32] : memref<8x72xf32, #tpu.memory_space<vmem>>, vector<8x72xf32>
    %108 = vector.shape_cast %107 : vector<8x72xf32> to vector<1x8x72xf32>
    "tpu.trace_start"() <{level = 10 : i32, message = "nok,nkp->nop"}> : () -> ()
    %cst_33 = arith.constant dense<0.000000e+00> : vector<1x8x256xf32>
    %109 = tpu.matmul %108, %106, %cst_33 {dimension_numbers = #tpu.dot_dimension_numbers<[2], [1], [1], [2], [0, 0, 0, 1, 1, 2], [0], [0]>} : vector<1x8x72xf32>, vector<1x72x256xf32>, vector<1x8x256xf32> -> vector<1x8x256xf32>
    "tpu.trace_stop"() : () -> ()
    %cst_34 = arith.constant dense<0.000000e+00> : vector<1x8xf32>
    %110 = vector.multi_reduction <add>, %109, %cst_34 [2] : vector<1x8x256xf32> to vector<1x8xf32>
    %111 = vector.shape_cast %110 : vector<1x8xf32> to vector<1x8x1xf32>
    %112 = arith.mulf %109, %109 : vector<1x8x256xf32>
    %cst_35 = arith.constant dense<0.000000e+00> : vector<1x8xf32>
    %113 = vector.multi_reduction <add>, %112, %cst_35 [2] : vector<1x8x256xf32> to vector<1x8xf32>
    %114 = vector.shape_cast %113 : vector<1x8xf32> to vector<1x8x1xf32>
    %cst_36 = arith.constant 3.906250e-03 : f32
    %115 = vector.broadcast %cst_36 : f32 to vector<1x8x1xf32>
    %116 = arith.mulf %111, %115 : vector<1x8x1xf32>
    %cst_37 = arith.constant 3.906250e-03 : f32
    %117 = vector.broadcast %cst_37 : f32 to vector<1x8x1xf32>
    %118 = arith.mulf %114, %117 : vector<1x8x1xf32>
    %119 = arith.mulf %116, %116 : vector<1x8x1xf32>
    %120 = arith.subf %118, %119 : vector<1x8x1xf32>
    %c0_38 = arith.constant 0 : index
    %c0_39 = arith.constant 0 : index
    %121 = vector.load %arg6[%c0_38, %c0_39] : memref<8x1xf32, #tpu.memory_space<vmem>>, vector<8x1xf32>
    %122 = vector.shape_cast %121 : vector<8x1xf32> to vector<1x8x1xf32>
    %cst_40 = arith.constant 9.99999974E-6 : f32
    %123 = vector.broadcast %cst_40 : f32 to vector<1x8x1xf32>
    %124 = arith.addf %120, %123 : vector<1x8x1xf32>
    %125 = math.rsqrt %124 : vector<1x8x1xf32>
    %126 = arith.mulf %122, %125 : vector<1x8x1xf32>
    %c0_41 = arith.constant 0 : index
    %c0_42 = arith.constant 0 : index
    %127 = vector.load %arg7[%c0_41, %c0_42] : memref<8x1xf32, #tpu.memory_space<vmem>>, vector<8x1xf32>
    %128 = vector.shape_cast %127 : vector<8x1xf32> to vector<1x8x1xf32>
    %129 = arith.mulf %116, %126 : vector<1x8x1xf32>
    %130 = arith.subf %128, %129 : vector<1x8x1xf32>
    %131 = vector.broadcast %126 : vector<1x8x1xf32> to vector<1x8x256xf32>
    %132 = arith.mulf %109, %131 : vector<1x8x256xf32>
    %133 = vector.broadcast %130 : vector<1x8x1xf32> to vector<1x8x256xf32>
    %134 = arith.addf %132, %133 : vector<1x8x256xf32>
    %135 = arith.addf %0, %134 : vector<1x8x256xf32>
    %c0_43 = arith.constant 0 : index
    %c0_44 = arith.constant 0 : index
    %c0_45 = arith.constant 0 : index
    %136 = vector.load %arg9[%c0_43, %c0_44, %c0_45] : memref<1x8x256xf32, #tpu.memory_space<vmem>>, vector<1x8x256xf32>
    tpu.vector_store %arg9[%c0_43, %c0_44, %c0_45], %135 {strides = array<i32>} : memref<1x8x256xf32, #tpu.memory_space<vmem>>, vector<1x8x256xf32>,
    return
  }
  func.func @transform_0(%arg0: i32) -> (i32, i32, i32) {
    %c0_i32 = arith.constant 0 : i32
    %c0_i32_0 = arith.constant 0 : i32
    %c0_i32_1 = arith.constant 0 : i32
    return %arg0, %c0_i32, %c0_i32_0 : i32, i32, i32
  }
  func.func @transform_1(%arg0: i32) -> (i32, i32) {
    %c0_i32 = arith.constant 0 : i32
    %c0_i32_0 = arith.constant 0 : i32
    %c0_i32_1 = arith.constant 0 : i32
    return %c0_i32, %c0_i32_0 : i32, i32
  }
  func.func @transform_2(%arg0: i32) -> (i32, i32) {
    %c0_i32 = arith.constant 0 : i32
    %c0_i32_0 = arith.constant 0 : i32
    %c0_i32_1 = arith.constant 0 : i32
    return %c0_i32, %c0_i32_0 : i32, i32
  }
  func.func @transform_3(%arg0: i32) -> (i32, i32) {
    %c0_i32 = arith.constant 0 : i32
    %c0_i32_0 = arith.constant 0 : i32
    %c0_i32_1 = arith.constant 0 : i32
    return %c0_i32, %c0_i32_0 : i32, i32
  }
  func.func @transform_4(%arg0: i32) -> (i32, i32) {
    %c0_i32 = arith.constant 0 : i32
    %c0_i32_0 = arith.constant 0 : i32
    %c0_i32_1 = arith.constant 0 : i32
    return %c0_i32, %c0_i32_0 : i32, i32
  }
  func.func @transform_5(%arg0: i32) -> (i32, i32) {
    %c0_i32 = arith.constant 0 : i32
    %c0_i32_0 = arith.constant 0 : i32
    %c0_i32_1 = arith.constant 0 : i32
    return %c0_i32, %c0_i32_0 : i32, i32
  }
  func.func @transform_6(%arg0: i32) -> (i32, i32) {
    %c0_i32 = arith.constant 0 : i32
    %c0_i32_0 = arith.constant 0 : i32
    %c0_i32_1 = arith.constant 0 : i32
    return %c0_i32, %c0_i32_0 : i32, i32
  }
  func.func @transform_7(%arg0: i32) -> (i32, i32) {
    %c0_i32 = arith.constant 0 : i32
    %c0_i32_0 = arith.constant 0 : i32
    %c0_i32_1 = arith.constant 0 : i32
    return %c0_i32, %c0_i32_0 : i32, i32
  }
  func.func @transform_8(%arg0: i32) -> (i32, i32, i32) {
    %c0_i32 = arith.constant 0 : i32
    %c0_i32_0 = arith.constant 0 : i32
    %c0_i32_1 = arith.constant 0 : i32
    return %arg0, %c0_i32, %c0_i32_0 : i32, i32, i32
  }
}

</mosaic_0001>

<bundles_post_ra>
// kernel: tpu_custom_call.1
= control target key start
LH: loop header
LB: loop body
LE: loop exit
PB: predicated region body
PF: predicated region fallthrough
CT: control target
= control target key end

     0   :  { %13 = vsyncpa [#allocation3], 0  ;;  %s1626_s0 = inlined_call_operand.vmem [shape: f32[2,8,256], index: 0, kind: input, shape index: {}]   ;;  %s1627_s1 = inlined_call_operand.hbm [shape: f32[8,72], index: 1, kind: input, shape index: {}]   ;;  %s1628_s2 = inlined_call_operand.vmem [shape: f32[8,1], index: 2, kind: input, shape index: {}]   ;;  %s1629_s3 = inlined_call_operand.vmem [shape: f32[8,1], index: 3, kind: input, shape index: {}]   ;;  %s1630_s4 = inlined_call_operand.vmem [shape: f32[8,72], index: 4, kind: input, shape index: {}]   ;;  %s1631_s5 = inlined_call_operand.vmem [shape: f32[8,1], index: 5, kind: input, shape index: {}]   ;;  %s1632_s6 = inlined_call_operand.vmem [shape: f32[8,1], index: 6, kind: input, shape index: {}]   ;;  %s1633_s7 = inlined_call_operand.hbm [shape: f32[9,256], index: 7, kind: input, shape index: {}]   ;;  %s1634_s8 = inlined_call_operand.hbm [shape: f32[2,8,256], index: 8, kind: output, shape index: {}]  }
   0x1   :  { %14 = vsyncpa [#allocation6], 0 }
   0x2   :  { %15 = vsyncpa [#allocation4], 0 }
   0x3   :  { %17 = vsyncpa [#allocation4 + $0x1], 0  ;;  %s1212_s27 = smov 0   ;;  %s1214_s28 = smov 0  }
   0x4   :  { %s1216_s29 = smov 0   ;;  %s1218_s30 = smov 0  }
   0x5 LB: > { %s1233_s9 = sadd.s32 4294967295, %s1150_s30   ;;  %s894_s10 = sadd.s32 4294967294, %s1150_s30   ;;  %s1150_s30 = sphi %s1218_s30, %s1652_s30   ;;  %s1146_s29 = sphi %s1216_s29, %s1651_s29   ;;  %s1142_s28 = sphi %s1214_s28, %s1650_s28   ;;  %s1138_s27 = sphi %s1212_s27, %s1649_s27  }
   0x6   : > { %s1237_s11 = sadd.s32 1, %s1150_s30   ;;  %s203_s12 = sadd.s32 1, %s1146_s29 }
   0x7   : > { %s200_s13 = ssub.s32 %s1150_s30, %s1237_s11  ;;  %p213_p0 = scmp.ne.s32.totalorder %s1146_s29, %s1142_s28 }
   0x8   : > { %p201_p1 = scmp.eq.s32.totalorder %s200_s13, 0  ;;  %p214_p2 = scmp.eq.s32.totalorder %s1233_s9, 1 }
   0x9   : > { %p219_p3 = scmp.ne.s32.totalorder %s1142_s28, %s1138_s27  ;;  %p220_p4 = scmp.eq.s32.totalorder %s894_s10, 1 }
   0xa   : > { %s1248_s14 = scalar_select %p201_p1, %s1146_s29, %s203_s12  }
   0xb   : > { %p1250_p5 = por %p214_p2, %p213_p0  ;;  %p1254_p6 = por %p220_p4, %p219_p3 }
   0xc   : > { %p895_p7 = scmp.ge.s32.totalorder %s1150_s30, 1  ;;  %p227_p8 = scmp.lt.s32.totalorder %s1150_s30, 3 }
   0xd   : > { %s1638_s15 = scalar_select %p1250_p5, 1, 0 }
   0xe   : > { %s1639_s16 = scalar_select %p1254_p6, 1, 0 }
   0xf   : > { %p1635_p9 = scmp.eq.s32.totalorder %s1233_s9, 0  ;;  %p1261_p10 = pnand %p895_p7, %p227_p8 }
  0x10   : > { %s1152_s18 = smov [#allocation2]   ;;  %s1153_s20 = smov [#allocation5]  }
  0x11   : > { %s1640_s17 = scalar_select %p1261_p10, 1, 0 }
  0x12   : > { %s240_s19 = sshll.u32 %s1152_s18, 4  ;;  %p956_p11 = pneg %p1261_p10  ;;  %s241_s19 = int_to_ptr.vmem [resolvable:$true] %s240_s19 }
  0x13   : > { %s265_s21 = sshll.u32 %s1153_s20, 4  ;;  %s1024_s25 = scalar_lea.hbm %s1627_s1, 128  ;;  %s1273_s21 = int_to_ptr.vmem [resolvable:$true] %s265_s21 }
  0x14   : > { %p1269_p12 = pnand %p1635_p9, %p956_p11  ;;  %p1025_p13 = scmp.ne.s32.totalorder %s1627_s1, %s1024_s25 }
  0x15   : > { %p1031_p3 = scmp.lt.u32.totalorder %s1024_s25, %s1627_s1 }
  0x16   : > { %p1026_p0 = pneg %p1269_p12 }
  0x18   : > { %p1027_p1 = pnand %p1026_p0, %p1025_p13 }
  0x1a   : > { %p1028_p2 = pneg %p1027_p1 }
  0x1c   : > { %p1033_p4 = pnand %p1031_p3, %p1028_p2 }
  0x1e   : > { %1036 = shalt.err (!%p1033_p4)
}
  0x1f   : > { %s1037_s18 = scalar_lea.vmem %s241_s19, 128  ;;  %p1045_p9 = scmp.lt.s32.totalorder %s241_s19, %s241_s19 }
  0x20   : > { %p1038_p7 = scmp.ne.s32.totalorder %s241_s19, %s1037_s18  ;;  %p1046_p6 = scmp.lt.s32.totalorder %s1037_s18, %s1037_s18 }
  0x22   : > { %p1040_p8 = pnand %p1038_p7, %p1026_p0  ;;  %p1047_p5 = por %p1046_p6, %p1045_p9 }
  0x24   : > { %p1041_p11 = pneg %p1040_p8 }
  0x26   : > { %p1048_p10 = pnand %p1047_p5, %p1041_p11 }
  0x28   : > { %1051 = shalt.err (!%p1048_p10)
}
  0x29   : > { %959 = dma.hbm_to_vmem [thread:$0]  (!%p1269_p12), %s1627_s1, 128, %s241_s19, [#allocation3]  }
  0x2a   : > { %s1052_s26 = scalar_lea.hbm %s1633_s7, 512 }
  0x2b   : > { %p1053_p13 = scmp.ne.s32.totalorder %s1633_s7, %s1052_s26  ;;  %p1059_p9 = scmp.lt.u32.totalorder %s1052_s26, %s1633_s7 }
  0x2d   : > { %p1055_p6 = pnand %p1053_p13, %p1026_p0 }
  0x2f   : > { %p1056_p5 = pneg %p1055_p6 }
  0x31   : > { %p1061_p10 = pnand %p1059_p9, %p1056_p5 }
  0x33   : > { %1064 = shalt.err (!%p1061_p10)
}
  0x34   : > { %s1065_s19 = scalar_lea.vmem %s1273_s21, 512  ;;  %p1073_p4 = scmp.lt.s32.totalorder %s1273_s21, %s1273_s21 }
  0x35   : > { %p1066_p1 = scmp.ne.s32.totalorder %s1273_s21, %s1065_s19  ;;  %p1074_p7 = scmp.lt.s32.totalorder %s1065_s19, %s1065_s19 }
  0x37   : > { %p1068_p2 = pnand %p1066_p1, %p1026_p0  ;;  %p1075_p8 = por %p1074_p7, %p1073_p4 }
  0x39   : > { %p1069_p3 = pneg %p1068_p2 }
  0x3b   : > { %p1076_p11 = pnand %p1075_p8, %p1069_p3 }
  0x3d   : > { %1079 = shalt.err (!%p1076_p11)
}
  0x3e   : > { %s1154_s20 = smov 256   ;;  %s1155_s23 = smov 16  }
  0x3f   : > { %962 = dma.hbm_to_vmem [thread:$0]  (!%p1269_p12), %s1633_s7, 512, %s1273_s21, [#allocation6], %s1154_s20, %s1154_s20, %s1155_s23  }
  0x40   : > { %p1642_p13 = scmp.ne.s32.totalorder %s1640_s17, 0 }
  0x41   : > { %p1643_p0 = scmp.eq.s32.totalorder (!%p1642_p13), %s1233_s9, 0 }
  0x42   : > { %289 = sbr.rel (%p1642_p13) target bundleno = 1438 (0x59e), region = 52 }
  0x49   : > { %1125 = dma.done.wait (%p1643_p0), [#allocation3], 128   ;;  %p1644_p6 = pmov %p1643_p0 }
  0x4a   : > { %p1645_p5 = pmov %p1643_p0 }
  0x4b   : > { %1127 = vsyncadd (%p1644_p6), [#allocation3], 4294967168 }
  0x4c   : > { %1129 = dma.done.wait (%p1645_p5), [#allocation6], 512   ;;  %p1646_p9 = pmov %p1643_p0 }
  0x4d   : > { %p327_p10 = scmp.lt.s32.totalorder %s1233_s9, 1  ;;  %s1156_s12 = smov 16   ;;  %v1162_v2 = vmov 0.0   ;;  %v353_v3 = vlaneseq  ;;  %v336_v8 = vld [vmem:[#allocation5 + $0x1] ss:$8 sm:$0x3] }
  0x4e   : > { %1131 = vsyncadd (%p1646_p9), [#allocation6], 4294966784  ;;  %s1157_s13 = smov 17   ;;  %s1158_s18 = smov 15   ;;  %580 = vmatprep.mubr.f32.mxu0 %v1162_v2  ;;  %754 = vmatprep.mubr.f32.mxu1 %v1162_v2  ;;  %vm512_vm8 = vcmask 588800  }
  0x4f   : > { %s328_s22 = scalar_select %p327_p10, %s1233_s9, 1  ;;  %v360_v4 = vshrl.u32 %v353_v3, 7  ;;  %v1373_v5 = vand.u32 127, %v353_v3  ;;  %v334_v9 = vld [vmem:[#allocation5] ss:$8 sm:$0x3] }
  0x50   : > { %s1159_s19 = smov 1   ;;  %s1160_s20 = smov 127   ;;  %v338_v26 = vld [vmem:[#allocation5 + $0x2] ss:$8 sm:$0x3] }
  0x51   : > { %s912_s21 = sshll.u32 %s328_s22, 4  ;;  %s1161_s23 = smov 113   ;;  %v1375_v6 = vsub.s32 0, %v360_v4  ;;  %v1377_v7 = vsub.s32 1, %v360_v4  ;;  %vm375_vm0 = vcmp.lt.s32.totalorder %v1373_v5, 16  ;;  %vm355_vm1 = vcmp.lt.s32.totalorder %v1373_v5, 17 }
  0x52   : > { %s331_s10 = scalar_lea.vmem %s1626_s0, %s912_s21  ;;  %s1163_s24 = smov 112   ;;  %v340_v27 = vld [vmem:[#allocation5 + $0x3] ss:$8 sm:$0x3]  ;;  %vm395_vm2 = vcmp.lt.s32.totalorder %v1373_v5, 15  ;;  %vm415_vm3 = vcmp.lt.s32.totalorder %v1373_v5, 1 }
  0x53   : > { %v1337_v0 = vld [vmem:[%s331_s10] sm:$0xff]  ;;  %v1343_v1 = vld [vmem:[%s331_s10 + $0x8] sm:$0xff]  ;;  %s1164_s25 = smov 111   ;;  %v1382_v12 = vrot.slane %v336_v8, %v1375_v6  ;;  %v1385_v13 = vrot.slane %v334_v9, %v1375_v6  ;;  %v1388_v14 = vrot.slane %v334_v9, %v1377_v7  ;;  %v1391_v15 = vrot.slane %v336_v8, %v1377_v7  ;;  %p1647_p1 = scmp.ne.s32.totalorder %s1638_s15, 0 }
  0x54   : > { %371 = vrot.lane.b32.xlu1 %v1337_v0, %s1156_s12  ;;  %349 = vrot.lane.b32.xlu0 %v1337_v0, %s1157_s13  ;;  %v1408_v32 = vrot.slane %v338_v26, %v1375_v6  ;;  %v1411_v33 = vrot.slane %v338_v26, %v1377_v7  ;;  %v1414_v34 = vrot.slane %v340_v27, %v1375_v6  ;;  %v342_v36 = vld [vmem:[#allocation5 + $0x5] ss:$8 sm:$0x3]  ;;  %vm435_vm4 = vcmp.lt.s32.totalorder %v1373_v5, 127 }
  0x55   : > { %v1417_v35 = vrot.slane %v340_v27, %v1377_v7  ;;  %v1429_v43 = vrot.slane %v342_v36, %v1375_v6  ;;  %v1432_v44 = vrot.slane %v342_v36, %v1377_v7  ;;  %v344_v57 = vld [vmem:[#allocation5 + $0x6] ss:$8 sm:$0x3]  ;;  %v346_v58 = vld [vmem:[#allocation5 + $0x7] ss:$8 sm:$0x3] }
  0x56   : > { %vm455_vm5 = vcmp.lt.s32.totalorder %v1373_v5, 113  ;;  %v1448_v63 = vrot.slane %v344_v57, %v1375_v6  ;;  %v1451_v2 = vrot.slane %v344_v57, %v1377_v7  ;;  %vm475_vm6 = vcmp.lt.s32.totalorder %v1373_v5, 112  ;;  %v348_v8 = vld [vmem:[#allocation5 + $0x10] ss:$8 sm:$0x3] }
  0x57   : > { %v1455_v3 = vrot.slane %v346_v58, %v1375_v6  ;;  %v1458_v4 = vrot.slane %v346_v58, %v1377_v7  ;;  %vm495_vm7 = vcmp.lt.s32.totalorder %v1373_v5, 111  ;;  %v511_v36 = vld [vmem:[#allocation2] sm:$0xff] }
  0x58   : > { %373 = vrot.lane.b32.xlu1 %v1343_v1, %s1156_s12  ;;  %351 = vrot.lane.b32.xlu0 %v1343_v1, %s1157_s13 }
  0x5c   : > { %393 = vrot.lane.b32.xlu1 %v1343_v1, %s1158_s18  ;;  %391 = vrot.lane.b32.xlu0 %v1337_v0, %s1158_s18 }
  0x60   : > { %413 = vrot.lane.b32.xlu1 %v1343_v1, %s1159_s19  ;;  %411 = vrot.lane.b32.xlu0 %v1337_v0, %s1159_s19 }
  0x64   : > { %433 = vrot.lane.b32.xlu1 %v1343_v1, %s1160_s20  ;;  %431 = vrot.lane.b32.xlu0 %v1337_v0, %s1160_s20 }
  0x68   : > { %453 = vrot.lane.b32.xlu1 %v1343_v1, %s1161_s23  ;;  %451 = vrot.lane.b32.xlu0 %v1337_v0, %s1161_s23 }
  0x6c   : > { %473 = vrot.lane.b32.xlu1 %v1343_v1, %s1163_s24  ;;  %471 = vrot.lane.b32.xlu0 %v1337_v0, %s1163_s24 }
  0x70   : > { %493 = vrot.lane.b32.xlu1 %v1343_v1, %s1164_s25  ;;  %491 = vrot.lane.b32.xlu0 %v1337_v0, %s1164_s25 }
  0xc6   : > { %v372_v10 = vpop.permute.xlu1 %371  ;;  %v350_v11 = vpop.permute.xlu0 %349 }
  0xca   : > { %v374_v16 = vpop.permute.xlu1 %373  ;;  %v352_v17 = vpop.permute.xlu0 %351 }
  0xcb   : > { %v376_v18 = vsel %vm375_vm0, %v372_v10, %v374_v16  ;;  %v377_v19 = vsel %vm375_vm0, %v374_v16, %v372_v10  ;;  %v356_v20 = vsel %vm355_vm1, %v350_v11, %v352_v17  ;;  %v357_v21 = vsel %vm355_vm1, %v352_v17, %v350_v11 }
  0xcc   : > { %v389_v22 = vmul.f32 %v1382_v12, %v377_v19  ;;  %v369_v23 = vmul.f32 %v1385_v13, %v357_v21  ;;  %v370_v24 = vmul.f32 %v1388_v14, %v356_v20  ;;  %v390_v25 = vmul.f32 %v1391_v15, %v376_v18 }
  0xcd   : > { %v1470_v19 = vrot.slane %v348_v8, %v1377_v7 }
  0xce   : > { %v394_v28 = vpop.permute.xlu1 %393  ;;  %v392_v29 = vpop.permute.xlu0 %391  ;;  %v914_v30 = vpack.c.bf16 %v390_v25, %v370_v24  ;;  %v916_v31 = vpack.c.bf16 %v389_v22, %v369_v23  ;;  %v1477_v24 = vrot.slane %v348_v8, %v1375_v6 }
  0xcf   : > { %v396_v37 = vsel %vm395_vm2, %v392_v29, %v394_v28  ;;  %v397_v38 = vsel %vm395_vm2, %v394_v28, %v392_v29 }
  0xd0   : > { %915 = vmatprep.subr.bf16.mxu0 %v914_v30  ;;  %v409_v45 = vmul.f32 %v1408_v32, %v397_v38  ;;  %v410_v46 = vmul.f32 %v1411_v33, %v396_v37 }
  0xd1   : > { %917 = vmatpush1.bf16.msra.mxu0 %v916_v31 }
  0xd2   : > { %v414_v39 = vpop.permute.xlu1 %413  ;;  %v412_v40 = vpop.permute.xlu0 %411 }
  0xd3   : > { %v416_v41 = vsel %vm415_vm3, %v412_v40, %v414_v39  ;;  %v417_v42 = vsel %vm415_vm3, %v414_v39, %v412_v40 }
  0xd4   : > { %v429_v47 = vmul.f32 %v1414_v34, %v417_v42  ;;  %v430_v48 = vmul.f32 %v1417_v35, %v416_v41  ;;  %v1165_v42 = vmov 0  }
  0xd5   : > { %1018 = vset.pattern.permute.xlu0 %v1165_v42  ;;  %1019 = vset.pattern.permute.xlu1 %v1165_v42 }
  0xd6   : > { %v434_v49 = vpop.permute.xlu1 %433  ;;  %v432_v50 = vpop.permute.xlu0 %431  ;;  %v918_v51 = vpack.c.bf16 %v430_v48, %v410_v46  ;;  %v920_v52 = vpack.c.bf16 %v429_v47, %v409_v45 }
  0xd7   : > { %v436_v53 = vsel %vm435_vm4, %v432_v50, %v434_v49  ;;  %v437_v54 = vsel %vm435_vm4, %v434_v49, %v432_v50 }
  0xd8   : > { %v449_v55 = vmul.f32 %v1429_v43, %v436_v53  ;;  %v450_v56 = vmul.f32 %v1432_v44, %v437_v54  ;;  %919 = vmatprep.subr.bf16.mxu0 %v918_v51 }
  0xd9   : > { %921 = vmatpush1.bf16.msra.mxu0 %v920_v52  ;;  %v599_v52 = vld [vmem:[%s1628_s2] sm:$0xff] }
  0xda   : > { %v454_v59 = vpop.permute.xlu1 %453  ;;  %v452_v60 = vpop.permute.xlu0 %451  ;;  %v922_v61 = vpack.c.bf16 %v450_v56, %v1343_v1  ;;  %v924_v62 = vpack.c.bf16 %v449_v55, %v1337_v0  ;;  %v603_v55 = vld [vmem:[%s1629_s3] sm:$0xff] }
  0xdb   : > { %v456_v9 = vsel %vm455_vm5, %v452_v60, %v454_v59  ;;  %v457_v10 = vsel %vm455_vm5, %v454_v59, %v452_v60 }
  0xdc   : > { %923 = vmatprep.subr.bf16.mxu0 %v922_v61  ;;  %v469_v20 = vmul.f32 %v1448_v63, %v456_v9  ;;  %v470_v21 = vmul.f32 %v1451_v2, %v457_v10 }
  0xdd   : > { %925 = vmatpush1.bf16.msra.mxu0 %v924_v62 }
  0xde   : > { %v474_v11 = vpop.permute.xlu1 %473  ;;  %v472_v16 = vpop.permute.xlu0 %471 }
  0xdf   : > { %v476_v17 = vsel %vm475_vm6, %v472_v16, %v474_v11  ;;  %v477_v18 = vsel %vm475_vm6, %v474_v11, %v472_v16 }
  0xe0   : > { %v489_v22 = vmul.f32 %v1455_v3, %v476_v17  ;;  %v490_v23 = vmul.f32 %v1458_v4, %v477_v18 }
  0xe2   : > { %v494_v25 = vpop.permute.xlu1 %493  ;;  %v926_v26 = vpack.c.bf16 %v490_v23, %v470_v21  ;;  %v492_v27 = vpop.permute.xlu0 %491  ;;  %v928_v28 = vpack.c.bf16 %v489_v22, %v469_v20 }
  0xe3   : > { %v496_v29 = vsel %vm495_vm7, %v492_v27, %v494_v25  ;;  %v497_v7 = vsel %vm495_vm7, %v494_v25, %v492_v27 }
  0xe4   : > { %927 = vmatprep.subr.bf16.mxu0 %v926_v26  ;;  %v510_v30 = vmul.f32 %v1470_v19, %v497_v7  ;;  %v509_v31 = vmul.f32 %v1477_v24, %v496_v29 }
  0xe5   : > { %929 = vmatpush1.bf16.msra.mxu0 %v928_v28 }
  0xe6   : > { %532 = vmatprep.subr.mxu0 %v510_v30 }
  0xe9   : > { %533 = vmatpush1.msra.mxu0 %v509_v31 }
  0xea   : > { %905 = vmatmul.mubr.msk.f32.vlgmr.msra.gmra.mrb[0].mxu0 %vm512_vm8, %v511_v36 }
 0x1bd   : > { %v582_v6 = vpop.f32.mrb[0].mxu0 }
 0x1be   : > { %v584_v37 = vpop.f32.mrb[1].mxu0  ;;  %v590_v38 = vmul.f32 %v582_v6, %v582_v6 }
 0x1bf   : > { %v591_v39 = vmul.f32 %v584_v37, %v584_v37  ;;  %v587_v40 = vadd.f32 %v584_v37, %v582_v6 }
 0x1c1   : > { %588 = vadd.xlane.f32.xlu0 %v587_v40  ;;  %v592_v41 = vadd.f32 %v591_v39, %v590_v38 }
 0x1c3   : > { %593 = vadd.xlane.f32.xlu1 %v592_v41 }
 0x24e   : > { %v589_v45 = vpop.xlane.xlu0 %588 }
 0x24f   : > { %v595_v46 = vmul.f32 0.00390625, %v589_v45 }
 0x250   : > { %v594_v47 = vpop.xlane.xlu1 %593 }
 0x251   : > { %v597_v48 = vmul.f32 %v595_v46, %v595_v46  ;;  %v596_v49 = vmul.f32 0.00390625, %v594_v47 }
 0x253   : > { %v598_v50 = vsub.f32 %v596_v49, %v597_v48 }
 0x255   : > { %v600_v51 = vadd.f32 1e-05, %v598_v50 }
 0x257   : > { %1020 = vrsqrt.f32 %v600_v51 }
 0x261   : > { %v1021_v53 = vpop.eup %1020 }
 0x262   : > { %v602_v54 = vmul.f32 %v1021_v53, %v599_v52 }
 0x264   : > { %608 = vperm.xlu0 %1018, %v602_v54   ;;  %v604_v56 = vmul.f32 %v602_v54, %v595_v46 }
 0x266   : > { %v605_v57 = vsub.f32 %v603_v55, %v604_v56 }
 0x268   : > { %615 = vperm.xlu1 %1019, %v605_v57  }
 0x2e3   : > { %v609_v58 = vpop.permute.xlu0 %608 }
 0x2e4   : > { %v611_v59 = vmul.f32 %v609_v58, %v582_v6  ;;  %v612_v61 = vmul.f32 %v609_v58, %v584_v37 }
 0x2e7   : > { %v616_v60 = vpop.permute.xlu1 %615 }
 0x2e8   : > { %v618_v62 = vadd.f32 %v616_v60, %v611_v59  ;;  %v619_v8 = vadd.f32 %v616_v60, %v612_v61 }
 0x2ea   : > { %v1492_v9 = vmax.f32 %v618_v62, 0.0  ;;  %v621_v10 = vmax.f32 %v619_v8, 0.0 }
 0x2ec   : > { %646 = vrot.lane.b32.xlu0 %v1492_v9, %s1159_s19  ;;  %622 = vrot.lane.b32.xlu1 %v1492_v9, %s1157_s13 }
 0x2f0   : > { %654 = vrot.lane.b32.xlu0 %v1492_v9, %s1160_s20  ;;  %624 = vrot.lane.b32.xlu1 %v621_v10, %s1157_s13  ;;  %s1166_s13 = smov [#allocation7]  }
 0x2f4   : > { %662 = vrot.lane.b32.xlu0 %v1492_v9, %s1161_s23  ;;  %630 = vrot.lane.b32.xlu1 %v1492_v9, %s1156_s12 }
 0x2f8   : > { %670 = vrot.lane.b32.xlu0 %v1492_v9, %s1163_s24  ;;  %632 = vrot.lane.b32.xlu1 %v621_v10, %s1156_s12 }
 0x2fc   : > { %678 = vrot.lane.b32.xlu0 %v1492_v9, %s1164_s25  ;;  %638 = vrot.lane.b32.xlu1 %v1492_v9, %s1158_s18 }
 0x300   : > { %640 = vrot.lane.b32.xlu1 %v621_v10, %s1158_s18  ;;  %s1084_s18 = sshll.u32 %s1166_s13, 4  ;;  %s1085_s18 = int_to_ptr.vmem [resolvable:$false] %s1084_s18 }
 0x304   : > { %648 = vrot.lane.b32.xlu1 %v621_v10, %s1159_s19  ;;  %s1086_s19 = scalar_lea.vmem %s1085_s18, 512 }
 0x308   : > { %656 = vrot.lane.b32.xlu1 %v621_v10, %s1160_s20 }
 0x30c   : > { %664 = vrot.lane.b32.xlu1 %v621_v10, %s1161_s23  ;;  %s324_s23 = sand.u32 1, %s1142_s28  }
 0x310   : > { %672 = vrot.lane.b32.xlu1 %v621_v10, %s1163_s24  ;;  %s902_s24 = sshll.u32 %s324_s23, 4 }
 0x311   : > { %s326_s22 = scalar_lea.vmem [#allocation7], %s902_s24 }
 0x312   : > { %s813_s21 = sshll.u32 %s326_s22, 4  ;;  %s1586_s21 = int_to_ptr.vmem [resolvable:$true] %s813_s21 }
 0x313   : > { %s1080_s12 = scalar_lea.vmem %s1586_s21, 256  ;;  %p1087_p4 = scmp.lt.s32.totalorder %s1586_s21, %s1085_s18 }
 0x314   : > { %680 = vrot.lane.b32.xlu1 %v621_v10, %s1164_s25  ;;  %s913_s25 = sshll.u32 %s1233_s9, 8  ;;  %s799_s9 = scalar_lea.sflag [#allocation4], %s324_s23 }
 0x315   : > { %s1584_s10 = scalar_lea.hbm %s1634_s8, %s913_s25  ;;  %p1081_p12 = scmp.ne.s32.totalorder %s1586_s21, %s1080_s12 }
 0x316   : > { %p1088_p7 = scmp.lt.s32.totalorder %s1086_s19, %s1080_s12 }
 0x317   : > { %p1082_p2 = pnand %p1081_p12, %p1647_p1 }
 0x318   : > { %p1089_p8 = por %p1088_p7, %p1087_p4 }
 0x319   : > { %p1083_p3 = pneg %p1082_p2 }
 0x31b   : > { %p1090_p11 = pnand %p1089_p8, %p1083_p3 }
 0x35e   : > { %v623_v11 = vpop.permute.xlu1 %622  ;;  %v647_v29 = vpop.permute.xlu0 %646 }
 0x362   : > { %v625_v16 = vpop.permute.xlu1 %624  ;;  %v655_v6 = vpop.permute.xlu0 %654 }
 0x363   : > { %v626_v18 = vsel %vm355_vm1, %v623_v11, %v625_v16  ;;  %v627_v20 = vsel %vm355_vm1, %v625_v16, %v623_v11 }
 0x364   : > { %v628_v25 = vmul.f32 %v627_v20, %v1385_v13  ;;  %v629_v27 = vmul.f32 %v626_v18, %v1388_v14 }
 0x366   : > { %v631_v17 = vpop.permute.xlu1 %630  ;;  %v663_v42 = vpop.permute.xlu0 %662 }
 0x36a   : > { %v633_v21 = vpop.permute.xlu1 %632  ;;  %v671_v51 = vpop.permute.xlu0 %670 }
 0x36b   : > { %v634_v22 = vsel %vm375_vm0, %v631_v17, %v633_v21  ;;  %v635_v23 = vsel %vm375_vm0, %v633_v21, %v631_v17 }
 0x36c   : > { %v636_v26 = vmul.f32 %v635_v23, %v1382_v12  ;;  %v637_v28 = vmul.f32 %v634_v22, %v1391_v15 }
 0x36e   : > { %v639_v7 = vpop.permute.xlu1 %638  ;;  %v930_v30 = vpack.c.bf16 %v637_v28, %v629_v27  ;;  %v932_v31 = vpack.c.bf16 %v636_v26, %v628_v25  ;;  %v679_v59 = vpop.permute.xlu0 %678  ;;  %v773_v25 = vld [vmem:[%s1631_s5] sm:$0xff] }
 0x36f   : > { %v777_v28 = vld [vmem:[%s1632_s6] sm:$0xff] }
 0x370   : > { %931 = vmatprep.subr.bf16.mxu1 %v930_v30 }
 0x371   : > { %933 = vmatpush1.bf16.msra.mxu1 %v932_v31 }
 0x372   : > { %v641_v36 = vpop.permute.xlu1 %640 }
 0x373   : > { %v642_v37 = vsel %vm395_vm2, %v639_v7, %v641_v36  ;;  %v643_v13 = vsel %vm395_vm2, %v641_v36, %v639_v7 }
 0x374   : > { %v644_v15 = vmul.f32 %v643_v13, %v1408_v32  ;;  %v645_v39 = vmul.f32 %v642_v37, %v1411_v33 }
 0x376   : > { %v649_v38 = vpop.permute.xlu1 %648 }
 0x377   : > { %v650_v12 = vsel %vm415_vm3, %v647_v29, %v649_v38  ;;  %v651_v14 = vsel %vm415_vm3, %v649_v38, %v647_v29 }
 0x378   : > { %v652_v40 = vmul.f32 %v651_v14, %v1414_v34  ;;  %v653_v41 = vmul.f32 %v650_v12, %v1417_v35 }
 0x37a   : > { %v657_v45 = vpop.permute.xlu1 %656  ;;  %v934_v46 = vpack.c.bf16 %v653_v41, %v645_v39  ;;  %v936_v47 = vpack.c.bf16 %v652_v40, %v644_v15 }
 0x37b   : > { %v658_v48 = vsel %vm435_vm4, %v655_v6, %v657_v45  ;;  %v659_v49 = vsel %vm435_vm4, %v657_v45, %v655_v6 }
 0x37c   : > { %v660_v50 = vmul.f32 %v658_v48, %v1429_v43  ;;  %v661_v32 = vmul.f32 %v659_v49, %v1432_v44  ;;  %935 = vmatprep.subr.bf16.mxu1 %v934_v46 }
 0x37d   : > { %937 = vmatpush1.bf16.msra.mxu1 %v936_v47 }
 0x37e   : > { %v665_v33 = vpop.permute.xlu1 %664  ;;  %v938_v34 = vpack.c.bf16 %v661_v32, %v621_v10  ;;  %v940_v35 = vpack.c.bf16 %v660_v50, %v1492_v9 }
 0x37f   : > { %v666_v52 = vsel %vm455_vm5, %v663_v42, %v665_v33  ;;  %v667_v53 = vsel %vm455_vm5, %v665_v33, %v663_v42 }
 0x380   : > { %939 = vmatprep.subr.bf16.mxu1 %v938_v34  ;;  %v668_v55 = vmul.f32 %v666_v52, %v1448_v63  ;;  %v669_v56 = vmul.f32 %v667_v53, %v1451_v2  ;;  %v686_v2 = vld [vmem:[%s1630_s4] sm:$0xff] }
 0x381   : > { %941 = vmatpush1.bf16.msra.mxu1 %v940_v35 }
 0x382   : > { %v673_v54 = vpop.permute.xlu1 %672 }
 0x383   : > { %v674_v43 = vsel %vm475_vm6, %v671_v51, %v673_v54  ;;  %v675_v44 = vsel %vm475_vm6, %v673_v54, %v671_v51 }
 0x384   : > { %v676_v57 = vmul.f32 %v674_v43, %v1455_v3  ;;  %v677_v58 = vmul.f32 %v675_v44, %v1458_v4 }
 0x386   : > { %v681_v60 = vpop.permute.xlu1 %680  ;;  %v942_v61 = vpack.c.bf16 %v677_v58, %v669_v56  ;;  %v944_v62 = vpack.c.bf16 %v676_v57, %v668_v55 }
 0x387   : > { %v683_v8 = vsel %vm495_vm7, %v681_v60, %v679_v59  ;;  %v682_v9 = vsel %vm495_vm7, %v679_v59, %v681_v60 }
 0x388   : > { %v685_v10 = vmul.f32 %v683_v8, %v1470_v19  ;;  %943 = vmatprep.subr.bf16.mxu1 %v942_v61  ;;  %v684_v63 = vmul.f32 %v682_v9, %v1477_v24 }
 0x389   : > { %945 = vmatpush1.bf16.msra.mxu1 %v944_v62 }
 0x38a   : > { %706 = vmatprep.subr.mxu1 %v685_v10 }
 0x38d   : > { %707 = vmatpush1.msra.mxu1 %v684_v63 }
 0x38e   : > { %906 = vmatmul.mubr.msk.f32.vlgmr.msra.gmra.mrb[0].mxu1 %vm512_vm8, %v686_v2 }
 0x461   : > { %v756_v3 = vpop.f32.mrb[0].mxu1 }
 0x462   : > { %v758_v4 = vpop.f32.mrb[1].mxu1  ;;  %v764_v11 = vmul.f32 %v756_v3, %v756_v3 }
 0x463   : > { %v765_v16 = vmul.f32 %v758_v4, %v758_v4  ;;  %v761_v5 = vadd.f32 %v758_v4, %v756_v3 }
 0x465   : > { %762 = vadd.xlane.f32.xlu0 %v761_v5  ;;  %v766_v17 = vadd.f32 %v765_v16, %v764_v11 }
 0x467   : > { %767 = vadd.xlane.f32.xlu1 %v766_v17 }
 0x4f2   : > { %v763_v19 = vpop.xlane.xlu0 %762 }
 0x4f3   : > { %v769_v18 = vmul.f32 0.00390625, %v763_v19 }
 0x4f4   : > { %v768_v20 = vpop.xlane.xlu1 %767 }
 0x4f5   : > { %v771_v24 = vmul.f32 %v769_v18, %v769_v18  ;;  %v770_v21 = vmul.f32 0.00390625, %v768_v20 }
 0x4f7   : > { %v772_v22 = vsub.f32 %v770_v21, %v771_v24 }
 0x4f9   : > { %v774_v23 = vadd.f32 1e-05, %v772_v22 }
 0x4fb   : > { %1022 = vrsqrt.f32 %v774_v23 }
 0x505   : > { %v1023_v26 = vpop.eup %1022 }
 0x506   : > { %v776_v27 = vmul.f32 %v1023_v26, %v773_v25 }
 0x508   : > { %782 = vperm.xlu0 %1018, %v776_v27   ;;  %v778_v29 = vmul.f32 %v776_v27, %v769_v18 }
 0x50a   : > { %v779_v7 = vsub.f32 %v777_v28, %v778_v29 }
 0x50c   : > { %789 = vperm.xlu1 %1019, %v779_v7  }
 0x587   : > { %v783_v30 = vpop.permute.xlu0 %782 }
 0x588   : > { %v785_v31 = vmul.f32 %v783_v30, %v756_v3  ;;  %v786_v36 = vmul.f32 %v783_v30, %v758_v4 }
 0x58b   : > { %v790_v6 = vpop.permute.xlu1 %789 }
 0x58c   : > { %v792_v37 = vadd.f32 %v790_v6, %v785_v31  ;;  %v793_v13 = vadd.f32 %v790_v6, %v786_v36 }
 0x58e   : > { %v794_v38 = vadd.f32 %v792_v37, %v1337_v0  ;;  %v795_v12 = vadd.f32 %v793_v13, %v1343_v1 }
 0x590   : > { %796 = vst [vmem:[%s326_s22] sm:$0xff] %v794_v38  ;;  %797 = vst [vmem:[%s326_s22 + $0x8] sm:$0xff] %v795_v12 }
 0x591   : > { %1093 = shalt.err (!%p1090_p11)
}
 0x592   : > { %s1094_s20 = scalar_lea.hbm %s1584_s10, 256  ;;  %s1098_s25 = scalar_lea.hbm %s1634_s8, 512 }
 0x593   : > { %p1095_p13 = scmp.ne.s32.totalorder %s1584_s10, %s1094_s20  ;;  %p1099_p5 = scmp.lt.u32.totalorder %s1584_s10, %s1634_s8 }
 0x594   : > { %p1100_p9 = scmp.lt.u32.totalorder %s1098_s25, %s1094_s20  ;;  %p1102_p12 = scmp.lt.u32.totalorder %s1094_s20, %s1584_s10 }
 0x595   : > { %p1096_p0 = pnand %p1095_p13, %p1647_p1 }
 0x596   : > { %p1101_p10 = por %p1100_p9, %p1099_p5 }
 0x597   : > { %p1097_p6 = pneg %p1096_p0 }
 0x598   : > { %p1103_p2 = por %p1102_p12, %p1101_p10 }
 0x59a   : > { %p1104_p3 = pnand %p1103_p2, %p1097_p6 }
 0x59c   : > { %1107 = shalt.err (!%p1104_p3)
}
 0x59d   : > { %954 = dma.vmem_to_hbm [thread:$0]  (%p1647_p1), %s1586_s21, 256, %s1584_s10, %s799_s9  }
 0x59e PF: > { %p971_p4 = scmp.ge.s32.totalorder %s1150_s30, 2  ;;  %s825_s17 = sand.u32 1, %s1138_s27  }
 0x59f   : > { %p1648_p7 = scmp.ne.s32.totalorder %s1639_s16, 0  ;;  %s826_s12 = scalar_lea.sflag [#allocation4], %s825_s17 }
 0x5a1   : > { %p964_p8 = pnand %p971_p4, %p1648_p7 }
 0x5a3   : > { %1133 = dma.done.wait (!%p964_p8), %s826_s12, 256  }
 0x5a4   : > { %1135 = vsyncadd (!%p964_p8), %s826_s12, 4294967040  ;;  %p20_p11 = scmp.ge.s32.totalorder %s1237_s11, 4   ;;  %s1649_s27 = smov %s1142_s28 }
 0x5a5   : > { %s1650_s28 = smov %s1146_s29  ;;  %s1651_s29 = smov %s1248_s14 }
 0x5a6   : > { %s1652_s30 = smov %s1237_s11  ;;  %22 = sbr.rel (!%p20_p11) target bundleno = 5 (0x5), region = 103 }
 0x5ad   :  { %831 = vsyncpa [#allocation3], 1 }
 0x5ae   :  { %833 = vsyncpa [#allocation3 + $0x1], 1 }
 0x5af   :  { %834 = vsyncpa [#allocation6], 1 }
 0x5b0   :  { %835 = vsyncpa [#allocation4], 1 }
 0x5b1   :  { %837 = vsyncpa [#allocation4 + $0x1], 1 }

</bundles_post_ra>
